<compile_context>
chip_gen: v7x
topology: tpu7x:2x2x1
jax: 0.10.0
libtpu: 0.0.40
codegen_flags: <defaults>
</compile_context>

<pallas_src>
import math

import jax
import jax.numpy as jnp
from jax.experimental import pallas as pl
from jax.experimental.pallas import tpu as pltpu


def _lstm_fused_kernel(x_ref, w_ih_ref, w_hh_ref, b_ref, w_out_ref, b_out_ref,
                       out_ref, gates_scr, hs_scr, h_scr, c_scr):
    """One batch chunk: full LSTM over time + fused output Linear.

    x_ref      : (1, T*Bc, D_in)   time-major, flattened per chunk (mxu dtype)
    w_ih_ref   : (D_in, 4*Hp)      gate order i|f|g|o, H padded to Hp (mxu dtype)
    w_hh_ref   : (Hp, 4*Hp)        (mxu dtype)
    b_ref      : (1, 4*Hp)         f32, b_ih + b_hh combined
    w_out_ref  : (Hp, Dop)         D_out padded to Dop (mxu dtype)
    b_out_ref  : (1, Dop)          f32
    out_ref    : (1, T*Bc, Dop)    f32
    gates_scr  : (T*Bc, 4*Hp) f32  pre-activations for all timesteps
    hs_scr     : (T*Bc, Hp)   f32  hidden states for all timesteps
    h_scr,c_scr: (Bc, Hp)     f32  recurrent state
    """
    bc, hp = h_scr.shape
    seq = gates_scr.shape[0] // bc

    # ---- (1) Hoisted input projection: one big MXU matmul for all timesteps.
    x = x_ref[0]                                         # (T*Bc, D_in)
    gates_scr[...] = (
        jnp.dot(x, w_ih_ref[...], preferred_element_type=jnp.float32)
        + b_ref[...])

    # ---- (2) Recurrence over VMEM-resident data (hidden0 = zeros).
    h_scr[...] = jnp.zeros_like(h_scr)
    c_scr[...] = jnp.zeros_like(c_scr)

    def step(t, carry):
        row = pl.multiple_of(t * bc, bc)                 # sublane-aligned offset
        g_pre = gates_scr[pl.ds(row, bc), :]             # (Bc, 4*Hp) f32
        h = h_scr[...]
        c = c_scr[...]
        gates = g_pre + jnp.dot(h.astype(w_hh_ref.dtype), w_hh_ref[...],
                                preferred_element_type=jnp.float32)
        # PyTorch gate order i, f, g, o; slices are 128-lane aligned (hp % 128 == 0).
        i = jax.nn.sigmoid(gates[:, 0:hp])
        f = jax.nn.sigmoid(gates[:, hp:2 * hp])
        g = jnp.tanh(gates[:, 2 * hp:3 * hp])
        o = jax.nn.sigmoid(gates[:, 3 * hp:4 * hp])
        c_new = f * c + i * g
        h_new = o * jnp.tanh(c_new)
        c_scr[...] = c_new
        h_scr[...] = h_new
        hs_scr[pl.ds(row, bc), :] = h_new
        return carry

    jax.lax.fori_loop(0, seq, step, 0)

    # ---- (3) Hoisted output Linear: one big MXU matmul, lane-dense store.
    out_ref[0] = (
        jnp.dot(hs_scr[...].astype(w_out_ref.dtype), w_out_ref[...],
                preferred_element_type=jnp.float32)
        + b_out_ref[...])


def _round_up(x, m):
    return (x + m - 1) // m * m


def predictor_forward(inputs, params, *, mxu_dtype=jnp.float32, batch_chunk=8):
    """inputs: (B, T, D_in) float32 -> (B, T, D_out) float32."""
    w_ih, w_hh, b, w_out, b_out = params
    B, T, D_in = inputs.shape
    H = w_hh.shape[0]
    D_out = w_out.shape[1]

    Hp = _round_up(H, 128)                 # lane-aligned hidden size
    Dop = _round_up(D_out, 128)            # lane-dense output store
    Bc = _round_up(max(batch_chunk, 8), 8)  # sublane-aligned batch chunk
    Bp = _round_up(B, Bc)
    n_chunks = Bp // Bc

    # ---- pad parameters (zero padding is exact for the LSTM recurrence) ----
    def pad_gate_cols(w):
        # (..., 4*H) with gate blocks [i|f|g|o] -> (..., 4*Hp)
        lead = w.shape[:-1]
        w4 = jnp.reshape(w, lead + (4, H))
        w4 = jnp.pad(w4, [(0, 0)] * len(lead) + [(0, 0), (0, Hp - H)])
        return jnp.reshape(w4, lead + (4 * Hp,))

    w_ih_p = pad_gate_cols(w_ih).astype(mxu_dtype)                     # (D_in, 4Hp)
    w_hh_p = jnp.pad(pad_gate_cols(w_hh),
                     ((0, Hp - H), (0, 0))).astype(mxu_dtype)          # (Hp, 4Hp)
    b_p = pad_gate_cols(b)                                             # (1, 4Hp) f32
    w_out_p = jnp.pad(w_out,
                      ((0, Hp - H), (0, Dop - D_out))).astype(mxu_dtype)  # (Hp, Dop)
    b_out_p = jnp.pad(b_out, ((0, 0), (0, Dop - D_out)))               # (1, Dop) f32

    # ---- input: (B,T,D) -> (n_chunks, T*Bc, D), time-major inside each chunk
    x = jnp.pad(inputs, ((0, Bp - B), (0, 0), (0, 0)))
    x = jnp.transpose(x, (1, 0, 2))                     # (T, Bp, D_in)
    x = x.reshape(T, n_chunks, Bc, D_in)
    x = jnp.transpose(x, (1, 0, 2, 3))                  # (n_chunks, T, Bc, D_in)
    x = x.reshape(n_chunks, T * Bc, D_in).astype(mxu_dtype)

    out_p = pl.pallas_call(
        _lstm_fused_kernel,
        out_shape=jax.ShapeDtypeStruct((n_chunks, T * Bc, Dop), jnp.float32),
        grid_spec=pltpu.PrefetchScalarGridSpec(
            num_scalar_prefetch=0,
            grid=(n_chunks,),                           # independent batch shards
            in_specs=[
                pl.BlockSpec((1, T * Bc, D_in), lambda k: (k, 0, 0)),
                pl.BlockSpec((D_in, 4 * Hp), lambda k: (0, 0)),
                pl.BlockSpec((Hp, 4 * Hp), lambda k: (0, 0)),
                pl.BlockSpec((1, 4 * Hp), lambda k: (0, 0)),
                pl.BlockSpec((Hp, Dop), lambda k: (0, 0)),
                pl.BlockSpec((1, Dop), lambda k: (0, 0)),
            ],
            out_specs=pl.BlockSpec((1, T * Bc, Dop), lambda k: (k, 0, 0)),
            scratch_shapes=[
                pltpu.VMEM((T * Bc, 4 * Hp), jnp.float32),   # gate pre-activations
                pltpu.VMEM((T * Bc, Hp), jnp.float32),       # all hidden states
                pltpu.VMEM((Bc, Hp), jnp.float32),           # h state
                pltpu.VMEM((Bc, Hp), jnp.float32),           # c state
            ],
        ),
        compiler_params=pltpu.CompilerParams(
            # Batch chunks are independent (state is re-initialized per chunk),
            # so "parallel" is safe and lets v7x's 2 TensorCores split them.
            dimension_semantics=("parallel",),
            vmem_limit_bytes=48 * 1024 * 1024,
        ),
    )(x, w_ih_p, w_hh_p, b_p, w_out_p, b_out_p)

    # ---- back to (B, T, D_out) ----
    out = out_p.reshape(n_chunks, T, Bc, Dop)
    out = jnp.transpose(out, (1, 0, 2, 3)).reshape(T, Bp, Dop)
    out = jnp.transpose(out, (1, 0, 2))                 # (Bp, T, Dop)
    return out[:B, :, :D_out]


def init_params(key, input_dim, hidden_dim, output_dim):
    """Deterministic init mimicking PyTorch's uniform(-1/sqrt(H), 1/sqrt(H))."""
    k = 1.0 / math.sqrt(hidden_dim)
    keys = jax.random.split(key, 6)
    # Transposed (D_in, 4H) / (H, 4H) layouts so the kernel does x @ W directly.
    # Gate order: i, f, g, o (PyTorch).
    w_ih = jax.random.uniform(keys[0], (input_dim, 4 * hidden_dim), jnp.float32, -k, k)
    w_hh = jax.random.uniform(keys[1], (hidden_dim, 4 * hidden_dim), jnp.float32, -k, k)
    b_ih = jax.random.uniform(keys[2], (4 * hidden_dim,), jnp.float32, -k, k)
    b_hh = jax.random.uniform(keys[3], (4 * hidden_dim,), jnp.float32, -k, k)
    b = (b_ih + b_hh).reshape(1, 4 * hidden_dim)
    w_out = jax.random.uniform(keys[4], (hidden_dim, output_dim), jnp.float32, -k, k)
    b_out = jax.random.uniform(keys[5], (output_dim,), jnp.float32, -k, k).reshape(1, output_dim)
    return (w_ih, w_hh, b, w_out, b_out)


def predictor_reference(inputs, params):
    """Pure-JAX reference (lax.scan LSTM) for correctness checking."""
    w_ih, w_hh, b, w_out, b_out = params
    B = inputs.shape[0]
    H = w_hh.shape[0]

    def step(carry, x_t):
        h, c = carry
        gates = x_t @ w_ih + h @ w_hh + b
        i = jax.nn.sigmoid(gates[:, 0:H])
        f = jax.nn.sigmoid(gates[:, H:2 * H])
        g = jnp.tanh(gates[:, 2 * H:3 * H])
        o = jax.nn.sigmoid(gates[:, 3 * H:4 * H])
        c_new = f * c + i * g
        h_new = o * jnp.tanh(c_new)
        return (h_new, c_new), h_new

    h0 = jnp.zeros((B, H), jnp.float32)
    c0 = jnp.zeros((B, H), jnp.float32)
    _, hs = jax.lax.scan(step, (h0, c0), jnp.transpose(inputs, (1, 0, 2)))
    out = hs @ w_out + b_out                    # (T, B, D_out)
    return jnp.transpose(out, (1, 0, 2))        # (B, T, D_out)


if __name__ == "__main__":
    # Small shapes consistent with Predictor(inputDim, hiddenDim, outputDim).
    # B=12 exercises batch padding (->16) and two "parallel" batch chunks.
    B, T = 12, 8
    INPUT_DIM, HIDDEN_DIM, OUTPUT_DIM = 8, 32, 4

    key = jax.random.PRNGKey(0)
    k_in, k_par = jax.random.split(key)
    inputs = jax.random.normal(k_in, (B, T, INPUT_DIM), dtype=jnp.float32)
    params = init_params(k_par, INPUT_DIM, HIDDEN_DIM, OUTPUT_DIM)

    ref = jax.block_until_ready(predictor_reference(inputs, params))

    # f32 MXU path: tight check against the pure-JAX reference.
    out_f32 = jax.block_until_ready(predictor_forward(inputs, params))
    assert out_f32.shape == (B, T, OUTPUT_DIM), out_f32.shape
    assert jnp.allclose(out_f32, ref, atol=2e-5, rtol=2e-5), "f32 mismatch vs reference"

    # bf16 MXU-input path (f32 accumulation + f32 gate math): loose check.
    out_bf16 = jax.block_until_ready(
        predictor_forward(inputs, params, mxu_dtype=jnp.bfloat16))
    assert out_bf16.shape == (B, T, OUTPUT_DIM), out_bf16.shape
    assert jnp.allclose(out_bf16, ref, atol=5e-2, rtol=5e-2), "bf16 mismatch vs reference"

    print("KERNEL_OK")
</pallas_src>

<mosaic_0001>
module attributes {stable_mosaic.version = 11 : i64} {
  func.func @_lstm_fused_kernel(%arg0: i32, %arg1: memref<1x64x8xf32, #tpu.memory_space<vmem>>, %arg2: memref<8x512xf32, #tpu.memory_space<vmem>>, %arg3: memref<128x512xf32, #tpu.memory_space<vmem>>, %arg4: memref<1x512xf32, #tpu.memory_space<vmem>>, %arg5: memref<128x128xf32, #tpu.memory_space<vmem>>, %arg6: memref<1x128xf32, #tpu.memory_space<vmem>>, %arg7: memref<1x64x128xf32, #tpu.memory_space<vmem>>, %arg8: memref<64x512xf32, #tpu.memory_space<vmem>>, %arg9: memref<64x128xf32, #tpu.memory_space<vmem>>, %arg10: memref<8x128xf32, #tpu.memory_space<vmem>>, %arg11: memref<8x128xf32, #tpu.memory_space<vmem>>) attributes {dimension_semantics = [#tpu.dimension_semantics<parallel>], iteration_bounds = array<i64: 2>, scalar_prefetch = 0 : i64, scratch_operands = 4 : i64, tpu.core_type = #tpu.core_type<tc>, window_params = [{transform_indices = @transform_0, window_bounds = array<i64: 1, 64, 8>}, {pipeline_mode = #tpu.pipeline_mode<synchronous>, transform_indices = @transform_1, window_bounds = array<i64: 8, 512>}, {pipeline_mode = #tpu.pipeline_mode<synchronous>, transform_indices = @transform_2, window_bounds = array<i64: 128, 512>}, {pipeline_mode = #tpu.pipeline_mode<synchronous>, transform_indices = @transform_3, window_bounds = array<i64: 1, 512>}, {pipeline_mode = #tpu.pipeline_mode<synchronous>, transform_indices = @transform_4, window_bounds = array<i64: 128, 128>}, {pipeline_mode = #tpu.pipeline_mode<synchronous>, transform_indices = @transform_5, window_bounds = array<i64: 1, 128>}, {transform_indices = @transform_6, window_bounds = array<i64: 1, 64, 128>}]} {
    %c0 = arith.constant 0 : index
    %c0_0 = arith.constant 0 : index
    %c0_1 = arith.constant 0 : index
    %0 = vector.load %arg1[%c0, %c0_0, %c0_1] : memref<1x64x8xf32, #tpu.memory_space<vmem>>, vector<1x64x8xf32>
    %1 = vector.shape_cast %0 : vector<1x64x8xf32> to vector<64x8xf32>
    %c0_2 = arith.constant 0 : index
    %c0_3 = arith.constant 0 : index
    %2 = vector.load %arg2[%c0_2, %c0_3] : memref<8x512xf32, #tpu.memory_space<vmem>>, vector<8x512xf32>
    %cst = arith.constant dense<0.000000e+00> : vector<64x512xf32>
    %3 = tpu.matmul %1, %2, %cst {dimension_numbers = #tpu.dot_dimension_numbers<[1], [0], [0], [1], [0, 0, 1, 1], [], []>} : vector<64x8xf32>, vector<8x512xf32>, vector<64x512xf32> -> vector<64x512xf32>
    %c0_4 = arith.constant 0 : index
    %c0_5 = arith.constant 0 : index
    %4 = vector.load %arg4[%c0_4, %c0_5] : memref<1x512xf32, #tpu.memory_space<vmem>>, vector<1x512xf32>
    %5 = vector.broadcast %4 : vector<1x512xf32> to vector<64x512xf32>
    %6 = arith.addf %3, %5 : vector<64x512xf32>
    %c0_6 = arith.constant 0 : index
    %c0_7 = arith.constant 0 : index
    %7 = vector.load %arg8[%c0_6, %c0_7] : memref<64x512xf32, #tpu.memory_space<vmem>>, vector<64x512xf32>
    tpu.vector_store %arg8[%c0_6, %c0_7], %6 {strides = array<i32>} : memref<64x512xf32, #tpu.memory_space<vmem>>, vector<64x512xf32>,
    %cst_8 = arith.constant 0.000000e+00 : f32
    %8 = vector.broadcast %cst_8 : f32 to vector<8x128xf32>
    %c0_9 = arith.constant 0 : index
    %c0_10 = arith.constant 0 : index
    %9 = vector.load %arg10[%c0_9, %c0_10] : memref<8x128xf32, #tpu.memory_space<vmem>>, vector<8x128xf32>
    tpu.vector_store %arg10[%c0_9, %c0_10], %8 {strides = array<i32>} : memref<8x128xf32, #tpu.memory_space<vmem>>, vector<8x128xf32>,
    %cst_11 = arith.constant 0.000000e+00 : f32
    %10 = vector.broadcast %cst_11 : f32 to vector<8x128xf32>
    %c0_12 = arith.constant 0 : index
    %c0_13 = arith.constant 0 : index
    %11 = vector.load %arg11[%c0_12, %c0_13] : memref<8x128xf32, #tpu.memory_space<vmem>>, vector<8x128xf32>
    tpu.vector_store %arg11[%c0_12, %c0_13], %10 {strides = array<i32>} : memref<8x128xf32, #tpu.memory_space<vmem>>, vector<8x128xf32>,
    %c0_i32 = arith.constant 0 : i32
    %c8_i32 = arith.constant 8 : i32
    %12 = arith.addi %c0_i32, %c8_i32 : i32
    %c1_i32 = arith.constant 1 : i32
    scf.for %arg12 = %c0_i32 to %12 step %c1_i32  : i32 {
      %c8_i32_25 = arith.constant 8 : i32
      %22 = arith.muli %arg12, %c8_i32_25 : i32
      %23 = tpu.assume_multiple %22, 8 : i32
      %24 = arith.index_cast %23 : i32 to index
      %c0_26 = arith.constant 0 : index
      %25 = vector.load %arg8[%24, %c0_26] : memref<64x512xf32, #tpu.memory_space<vmem>>, vector<8x512xf32>
      %c0_27 = arith.constant 0 : index
      %c0_28 = arith.constant 0 : index
      %26 = vector.load %arg10[%c0_27, %c0_28] : memref<8x128xf32, #tpu.memory_space<vmem>>, vector<8x128xf32>
      %c0_29 = arith.constant 0 : index
      %c0_30 = arith.constant 0 : index
      %27 = vector.load %arg11[%c0_29, %c0_30] : memref<8x128xf32, #tpu.memory_space<vmem>>, vector<8x128xf32>
      %c0_31 = arith.constant 0 : index
      %c0_32 = arith.constant 0 : index
      %28 = vector.load %arg3[%c0_31, %c0_32] : memref<128x512xf32, #tpu.memory_space<vmem>>, vector<128x512xf32>
      %cst_33 = arith.constant dense<0.000000e+00> : vector<8x512xf32>
      %29 = tpu.matmul %26, %28, %cst_33 {dimension_numbers = #tpu.dot_dimension_numbers<[1], [0], [0], [1], [0, 0, 1, 1], [], []>} : vector<8x128xf32>, vector<128x512xf32>, vector<8x512xf32> -> vector<8x512xf32>
      %30 = arith.addf %25, %29 : vector<8x512xf32>
      %31 = vector.extract_strided_slice %30 {offsets = [0, 0], sizes = [8, 128], strides = [1, 1]} : vector<8x512xf32> to vector<8x128xf32>
      %32 = arith.negf %31 : vector<8x128xf32>
      %33 = math.exp %32 : vector<8x128xf32>
      %cst_34 = arith.constant 1.000000e+00 : f32
      %34 = vector.broadcast %cst_34 : f32 to vector<8x128xf32>
      %35 = arith.addf %34, %33 : vector<8x128xf32>
      %36 = arith.divf %34, %35 : vector<8x128xf32>
      %37 = vector.extract_strided_slice %30 {offsets = [0, 128], sizes = [8, 128], strides = [1, 1]} : vector<8x512xf32> to vector<8x128xf32>
      %38 = arith.negf %37 : vector<8x128xf32>
      %39 = math.exp %38 : vector<8x128xf32>
      %cst_35 = arith.constant 1.000000e+00 : f32
      %40 = vector.broadcast %cst_35 : f32 to vector<8x128xf32>
      %41 = arith.addf %40, %39 : vector<8x128xf32>
      %42 = arith.divf %40, %41 : vector<8x128xf32>
      %43 = vector.extract_strided_slice %30 {offsets = [0, 256], sizes = [8, 128], strides = [1, 1]} : vector<8x512xf32> to vector<8x128xf32>
      %44 = math.tanh %43 : vector<8x128xf32>
      %45 = vector.extract_strided_slice %30 {offsets = [0, 384], sizes = [8, 128], strides = [1, 1]} : vector<8x512xf32> to vector<8x128xf32>
      %46 = arith.negf %45 : vector<8x128xf32>
      %47 = math.exp %46 : vector<8x128xf32>
      %cst_36 = arith.constant 1.000000e+00 : f32
      %48 = vector.broadcast %cst_36 : f32 to vector<8x128xf32>
      %49 = arith.addf %48, %47 : vector<8x128xf32>
      %50 = arith.divf %48, %49 : vector<8x128xf32>
      %51 = arith.mulf %42, %27 : vector<8x128xf32>
      %52 = arith.mulf %36, %44 : vector<8x128xf32>
      %53 = arith.addf %51, %52 : vector<8x128xf32>
      %54 = math.tanh %53 : vector<8x128xf32>
      %55 = arith.mulf %50, %54 : vector<8x128xf32>
      %c0_37 = arith.constant 0 : index
      %c0_38 = arith.constant 0 : index
      %56 = vector.load %arg11[%c0_37, %c0_38] : memref<8x128xf32, #tpu.memory_space<vmem>>, vector<8x128xf32>
      tpu.vector_store %arg11[%c0_37, %c0_38], %53 {strides = array<i32>} : memref<8x128xf32, #tpu.memory_space<vmem>>, vector<8x128xf32>,
      %c0_39 = arith.constant 0 : index
      %c0_40 = arith.constant 0 : index
      %57 = vector.load %arg10[%c0_39, %c0_40] : memref<8x128xf32, #tpu.memory_space<vmem>>, vector<8x128xf32>
      tpu.vector_store %arg10[%c0_39, %c0_40], %55 {strides = array<i32>} : memref<8x128xf32, #tpu.memory_space<vmem>>, vector<8x128xf32>,
      %58 = arith.index_cast %23 : i32 to index
      %c0_41 = arith.constant 0 : index
      %59 = vector.load %arg9[%58, %c0_41] : memref<64x128xf32, #tpu.memory_space<vmem>>, vector<8x128xf32>
      tpu.vector_store %arg9[%58, %c0_41], %55 {strides = array<i32>} : memref<64x128xf32, #tpu.memory_space<vmem>>, vector<8x128xf32>,
    }
    %c8_i32_14 = arith.constant 8 : i32
    %c0_15 = arith.constant 0 : index
    %c0_16 = arith.constant 0 : index
    %13 = vector.load %arg9[%c0_15, %c0_16] : memref<64x128xf32, #tpu.memory_space<vmem>>, vector<64x128xf32>
    %c0_17 = arith.constant 0 : index
    %c0_18 = arith.constant 0 : index
    %14 = vector.load %arg5[%c0_17, %c0_18] : memref<128x128xf32, #tpu.memory_space<vmem>>, vector<128x128xf32>
    %cst_19 = arith.constant dense<0.000000e+00> : vector<64x128xf32>
    %15 = tpu.matmul %13, %14, %cst_19 {dimension_numbers = #tpu.dot_dimension_numbers<[1], [0], [0], [1], [0, 0, 1, 1], [], []>} : vector<64x128xf32>, vector<128x128xf32>, vector<64x128xf32> -> vector<64x128xf32>
    %c0_20 = arith.constant 0 : index
    %c0_21 = arith.constant 0 : index
    %16 = vector.load %arg6[%c0_20, %c0_21] : memref<1x128xf32, #tpu.memory_space<vmem>>, vector<1x128xf32>
    %17 = vector.broadcast %16 : vector<1x128xf32> to vector<64x128xf32>
    %18 = arith.addf %15, %17 : vector<64x128xf32>
    %c0_22 = arith.constant 0 : index
    %c0_23 = arith.constant 0 : index
    %c0_24 = arith.constant 0 : index
    %19 = vector.load %arg7[%c0_22, %c0_23, %c0_24] : memref<1x64x128xf32, #tpu.memory_space<vmem>>, vector<1x64x128xf32>
    %20 = vector.shape_cast %19 : vector<1x64x128xf32> to vector<64x128xf32>
    %21 = vector.shape_cast %18 : vector<64x128xf32> to vector<1x64x128xf32>
    tpu.vector_store %arg7[%c0_22, %c0_23, %c0_24], %21 {strides = array<i32>} : memref<1x64x128xf32, #tpu.memory_space<vmem>>, vector<1x64x128xf32>,
    return
  }
  func.func @transform_0(%arg0: i32) -> (i32, i32, i32) {
    %c0_i32 = arith.constant 0 : i32
    %c0_i32_0 = arith.constant 0 : i32
    %c0_i32_1 = arith.constant 0 : i32
    return %arg0, %c0_i32, %c0_i32_0 : i32, i32, i32
  }
  func.func @transform_1(%arg0: i32) -> (i32, i32) {
    %c0_i32 = arith.constant 0 : i32
    %c0_i32_0 = arith.constant 0 : i32
    %c0_i32_1 = arith.constant 0 : i32
    return %c0_i32, %c0_i32_0 : i32, i32
  }
  func.func @transform_2(%arg0: i32) -> (i32, i32) {
    %c0_i32 = arith.constant 0 : i32
    %c0_i32_0 = arith.constant 0 : i32
    %c0_i32_1 = arith.constant 0 : i32
    return %c0_i32, %c0_i32_0 : i32, i32
  }
  func.func @transform_3(%arg0: i32) -> (i32, i32) {
    %c0_i32 = arith.constant 0 : i32
    %c0_i32_0 = arith.constant 0 : i32
    %c0_i32_1 = arith.constant 0 : i32
    return %c0_i32, %c0_i32_0 : i32, i32
  }
  func.func @transform_4(%arg0: i32) -> (i32, i32) {
    %c0_i32 = arith.constant 0 : i32
    %c0_i32_0 = arith.constant 0 : i32
    %c0_i32_1 = arith.constant 0 : i32
    return %c0_i32, %c0_i32_0 : i32, i32
  }
  func.func @transform_5(%arg0: i32) -> (i32, i32) {
    %c0_i32 = arith.constant 0 : i32
    %c0_i32_0 = arith.constant 0 : i32
    %c0_i32_1 = arith.constant 0 : i32
    return %c0_i32, %c0_i32_0 : i32, i32
  }
  func.func @transform_6(%arg0: i32) -> (i32, i32, i32) {
    %c0_i32 = arith.constant 0 : i32
    %c0_i32_0 = arith.constant 0 : i32
    %c0_i32_1 = arith.constant 0 : i32
    return %arg0, %c0_i32, %c0_i32_0 : i32, i32, i32
  }
}

</mosaic_0001>

<bundles_post_ra>
// kernel: tpu_custom_call.1
= control target key start
LH: loop header
LB: loop body
LE: loop exit
PB: predicated region body
PF: predicated region fallthrough
CT: control target
= control target key end

     0   :  { %11 = vsyncpa [#allocation7], 0  ;;  %s1922_s0 = inlined_call_operand.vmem [shape: f32[2,64,8], index: 0, kind: input, shape index: {}]   ;;  %s1923_s1 = inlined_call_operand.hbm [shape: f32[8,512], index: 1, kind: input, shape index: {}]   ;;  %s1924_s2 = inlined_call_operand.hbm [shape: f32[128,512], index: 2, kind: input, shape index: {}]   ;;  %s1925_s3 = inlined_call_operand.vmem [shape: f32[1,512], index: 3, kind: input, shape index: {}]   ;;  %s1926_s4 = inlined_call_operand.vmem [shape: f32[128,128], index: 4, kind: input, shape index: {}]   ;;  %s1927_s5 = inlined_call_operand.vmem [shape: f32[1,128], index: 5, kind: input, shape index: {}]   ;;  %s1928_s6 = inlined_call_operand.hbm [shape: f32[2,64,128], index: 6, kind: output, shape index: {}]  }
   0x1   :  { %12 = vsyncpa [#allocation10], 0 }
   0x2   :  { %13 = vsyncpa [#allocation8], 0 }
   0x3   :  { %15 = vsyncpa [#allocation8 + $0x1], 0  ;;  %s1596_s21 = smov 0   ;;  %s1598_s22 = smov 0  }
   0x4   :  { %s1600_s23 = smov 0   ;;  %s1602_s24 = smov 0  }
   0x5 LB: > { %s1617_s25 = sadd.s32 4294967295, %s1546_s24   ;;  %s1104_s26 = sadd.s32 4294967294, %s1546_s24   ;;  %s1546_s24 = sphi %s1602_s24, %s1946_s24   ;;  %s1542_s23 = sphi %s1600_s23, %s1945_s23   ;;  %s1538_s22 = sphi %s1598_s22, %s1944_s22   ;;  %s1534_s21 = sphi %s1596_s21, %s1943_s21  }
   0x6   : > { %s1621_s27 = sadd.s32 1, %s1546_s24   ;;  %s159_s28 = sadd.s32 1, %s1542_s23 }
   0x7   : > { %s156_s29 = ssub.s32 %s1546_s24, %s1621_s27  ;;  %p169_p0 = scmp.ne.s32.totalorder %s1542_s23, %s1538_s22 }
   0x8   : > { %p157_p1 = scmp.eq.s32.totalorder %s156_s29, 0  ;;  %p170_p2 = scmp.eq.s32.totalorder %s1617_s25, 1 }
   0x9   : > { %p175_p3 = scmp.ne.s32.totalorder %s1538_s22, %s1534_s21  ;;  %p176_p4 = scmp.eq.s32.totalorder %s1104_s26, 1 }
   0xa   : > { %s1632_s30 = scalar_select %p157_p1, %s1542_s23, %s159_s28  }
   0xb   : > { %p1634_p5 = por %p170_p2, %p169_p0  ;;  %p1638_p6 = por %p176_p4, %p175_p3 }
   0xc   : > { %p1105_p7 = scmp.ge.s32.totalorder %s1546_s24, 1  ;;  %p183_p8 = scmp.lt.s32.totalorder %s1546_s24, 3 }
   0xd   : > { %s1932_s7 = scalar_select %p1634_p5, 1, 0 }
   0xe   : > { %s1933_s8 = scalar_select %p1638_p6, 1, 0 }
   0xf   : > { %p1929_p9 = scmp.eq.s32.totalorder %s1617_s25, 0  ;;  %p1645_p10 = pnand %p1105_p7, %p183_p8 }
  0x10   : > { %s1552_s10 = smov [#allocation6]   ;;  %s1553_s12 = smov [#allocation9]  }
  0x11   : > { %s1934_s9 = scalar_select %p1645_p10, 1, 0 }
  0x12   : > { %s196_s11 = sshll.u32 %s1552_s10, 4  ;;  %p1336_p11 = pneg %p1645_p10  ;;  %s197_s11 = int_to_ptr.vmem [resolvable:$true] %s196_s11 }
  0x13   : > { %s206_s13 = sshll.u32 %s1553_s12, 4  ;;  %s1416_s17 = scalar_lea.hbm %s1923_s1, 512  ;;  %s1657_s13 = int_to_ptr.vmem [resolvable:$true] %s206_s13 }
  0x14   : > { %p1653_p12 = pnand %p1929_p9, %p1336_p11  ;;  %p1417_p13 = scmp.ne.s32.totalorder %s1923_s1, %s1416_s17 }
  0x15   : > { %p1423_p3 = scmp.lt.u32.totalorder %s1416_s17, %s1923_s1 }
  0x16   : > { %p1418_p0 = pneg %p1653_p12 }
  0x18   : > { %p1419_p1 = pnand %p1418_p0, %p1417_p13 }
  0x1a   : > { %p1420_p2 = pneg %p1419_p1 }
  0x1c   : > { %p1425_p4 = pnand %p1423_p3, %p1420_p2 }
  0x1e   : > { %1428 = shalt.err (!%p1425_p4)
}
  0x1f   : > { %s1429_s28 = scalar_lea.vmem %s197_s11, 512  ;;  %p1437_p9 = scmp.lt.s32.totalorder %s197_s11, %s197_s11 }
  0x20   : > { %p1430_p7 = scmp.ne.s32.totalorder %s197_s11, %s1429_s28  ;;  %p1438_p6 = scmp.lt.s32.totalorder %s1429_s28, %s1429_s28 }
  0x22   : > { %p1432_p8 = pnand %p1430_p7, %p1418_p0  ;;  %p1439_p5 = por %p1438_p6, %p1437_p9 }
  0x24   : > { %p1433_p11 = pneg %p1432_p8 }
  0x26   : > { %p1440_p10 = pnand %p1439_p5, %p1433_p11 }
  0x28   : > { %1443 = shalt.err (!%p1440_p10)
}
  0x29   : > { %1339 = dma.hbm_to_vmem [thread:$0]  (!%p1653_p12), %s1923_s1, 512, %s197_s11, [#allocation7]  }
  0x2a   : > { %s1444_s16 = scalar_lea.hbm %s1924_s2, 8192 }
  0x2b   : > { %p1445_p13 = scmp.ne.s32.totalorder %s1924_s2, %s1444_s16  ;;  %p1451_p9 = scmp.lt.u32.totalorder %s1444_s16, %s1924_s2 }
  0x2d   : > { %p1447_p6 = pnand %p1445_p13, %p1418_p0 }
  0x2f   : > { %p1448_p5 = pneg %p1447_p6 }
  0x31   : > { %p1453_p10 = pnand %p1451_p9, %p1448_p5 }
  0x33   : > { %1456 = shalt.err (!%p1453_p10)
}
  0x34   : > { %s1457_s11 = scalar_lea.vmem %s1657_s13, 8192  ;;  %p1465_p4 = scmp.lt.s32.totalorder %s1657_s13, %s1657_s13 }
  0x35   : > { %p1458_p1 = scmp.ne.s32.totalorder %s1657_s13, %s1457_s11  ;;  %p1466_p7 = scmp.lt.s32.totalorder %s1457_s11, %s1457_s11 }
  0x37   : > { %p1460_p2 = pnand %p1458_p1, %p1418_p0  ;;  %p1467_p8 = por %p1466_p7, %p1465_p4 }
  0x39   : > { %p1461_p3 = pneg %p1460_p2 }
  0x3b   : > { %p1468_p11 = pnand %p1467_p8, %p1461_p3 }
  0x3d   : > { %1471 = shalt.err (!%p1468_p11)
}
  0x3e   : > { %s1554_s26 = smov 512   ;;  %s1555_s28 = smov 32  }
  0x3f   : > { %1342 = dma.hbm_to_vmem [thread:$0]  (!%p1653_p12), %s1924_s2, 8192, %s1657_s13, [#allocation10], %s1554_s26, %s1554_s26, %s1555_s28  }
  0x40   : > { %p1936_p13 = scmp.ne.s32.totalorder %s1934_s9, 0 }
  0x41   : > { %p1937_p0 = scmp.eq.s32.totalorder (!%p1936_p13), %s1617_s25, 0 }
  0x42   : > { %239 = sbr.rel (%p1936_p13) target bundleno = 866 (0x362), region = 44 }
  0x49   : > { %1521 = dma.done.wait (%p1937_p0), [#allocation7], 512   ;;  %p1938_p6 = pmov %p1937_p0 }
  0x4a   : > { %p1939_p5 = pmov %p1937_p0 }
  0x4b   : > { %1523 = vsyncadd (%p1938_p6), [#allocation7], 4294966784 }
  0x4c   : > { %1525 = dma.done.wait (%p1939_p5), [#allocation10], 8192   ;;  %p1940_p9 = pmov %p1937_p0 }
  0x4d   : > { %s270_s13 = sand.u32 1, %s1538_s22   ;;  %p273_p12 = scmp.lt.s32.totalorder %s1617_s25, 1  ;;  %v1556_v0 = vmov 0.0   ;;  %v287_v1 = vld [vmem:[#allocation6 + $0x8] sm:$0xff]  ;;  %v289_v2 = vld [vmem:[#allocation6 + $0x18] sm:$0xff]  ;;  %v286_v3 = vld [vmem:[#allocation6] sm:$0xff]  ;;  %v292_v13 = vlaneseq }
  0x4e   : > { %1527 = vsyncadd (%p1940_p9), [#allocation10], 4294959104  ;;  %s1720_s9 = sshll.u32 %s270_s13, 6  ;;  %401 = vmatprep.mubr.f32.mxu0 %v1556_v0  ;;  %595 = vst [vmem:[#allocation4] sm:$0xff] %v1556_v0  ;;  %514 = vmatprep.mubr.f32.mxu1 %v1556_v0  ;;  %vm312_vm0 = vcmask 64512   ;;  %v288_v4 = vld [vmem:[#allocation6 + $0x10] sm:$0xff] }
  0x4f   : > { %596 = vst [vmem:[#allocation5] sm:$0xff] %v1556_v0  ;;  %s274_s14 = scalar_select %p273_p12, %s1617_s25, 1  ;;  %337 = vmatprep.subr.mxu0 %v287_v1  ;;  %450 = vmatprep.subr.mxu1 %v289_v2  ;;  %v293_v14 = vshrl.u32 %v292_v13, 7  ;;  %v290_v17 = vld [vmem:[%s1925_s3] sm:$0xf] }
  0x50   : > { %338 = vmatpush1.msra.mxu0 %v286_v3  ;;  %451 = vmatpush1.msra.mxu1 %v288_v4  ;;  %s1796_s20 = scalar_lea.vmem [#allocation11], %s1720_s9  ;;  %s1798_s11 = smov 0  }
  0x51   : > { %s1143_s12 = sshll.u32 %s274_s14, 6  ;;  %v294_v15 = vsub.s32 0, %v293_v14  ;;  %v302_v16 = vsub.s32 2, %v293_v14  ;;  %v298_v18 = vsub.s32 1, %v293_v14  ;;  %v306_v19 = vsub.s32 3, %v293_v14 }
  0x52   : > { %s1726_s17 = scalar_lea.vmem %s1922_s0, %s1143_s12 }
  0x53   : > { %v278_v5 = vld [vmem:[%s1726_s17] sm:$0xff]  ;;  %v279_v6 = vld [vmem:[%s1726_s17 + $0x8] sm:$0xff]  ;;  %v280_v7 = vld [vmem:[%s1726_s17 + $0x10] sm:$0xff]  ;;  %v1755_v20 = vrot.slane %v290_v17, %v294_v15  ;;  %v1757_v21 = vrot.slane %v290_v17, %v302_v16  ;;  %v1759_v22 = vrot.slane %v290_v17, %v298_v18  ;;  %v1761_v23 = vrot.slane %v290_v17, %v306_v19 }
  0x54   : > { %1115 = vmatmul.mubr.msk.f32.vlgmr.msra.gmra.mrb[0].mxu0 %vm312_vm0, %v278_v5  ;;  %1123 = vmatmul.mubr.msk.f32.vlgmr.msra.gmra.mrb[0].mxu1 %vm312_vm0, %v278_v5  ;;  %v281_v8 = vld [vmem:[%s1726_s17 + $0x18] sm:$0xff]  ;;  %v282_v9 = vld [vmem:[%s1726_s17 + $0x20] sm:$0xff]  ;;  %v283_v10 = vld [vmem:[%s1726_s17 + $0x28] sm:$0xff] }
  0x55   : > { %407 = vmatprep.mubr.f32.mxu0 %v1556_v0  ;;  %520 = vmatprep.mubr.f32.mxu1 %v1556_v0  ;;  %v284_v11 = vld [vmem:[%s1726_s17 + $0x30] sm:$0xff]  ;;  %v285_v12 = vld [vmem:[%s1726_s17 + $0x38] sm:$0xff] }
  0x58   : > { %1116 = vmatmul.mubr.msk.f32.gmra.mrb[2].mxu0 %vm312_vm0, %v279_v6  ;;  %1124 = vmatmul.mubr.msk.f32.gmra.mrb[2].mxu1 %vm312_vm0, %v279_v6 }
  0x59   : > { %413 = vmatprep.mubr.f32.mxu0 %v1556_v0  ;;  %526 = vmatprep.mubr.f32.mxu1 %v1556_v0 }
  0x5c   : > { %1117 = vmatmul.mubr.msk.f32.gmra.mrb[4].mxu0 %vm312_vm0, %v280_v7  ;;  %1125 = vmatmul.mubr.msk.f32.gmra.mrb[4].mxu1 %vm312_vm0, %v280_v7 }
  0x5d   : > { %419 = vmatprep.mubr.f32.mxu0 %v1556_v0  ;;  %532 = vmatprep.mubr.f32.mxu1 %v1556_v0 }
  0x60   : > { %1118 = vmatmul.mubr.msk.f32.gmra.mrb[6].mxu0 %vm312_vm0, %v281_v8  ;;  %1126 = vmatmul.mubr.msk.f32.gmra.mrb[6].mxu1 %vm312_vm0, %v281_v8 }
  0x61   : > { %425 = vmatprep.mubr.f32.mxu0 %v1556_v0  ;;  %538 = vmatprep.mubr.f32.mxu1 %v1556_v0 }
  0x64   : > { %1119 = vmatmul.mubr.msk.f32.gmra.mrb[8].mxu0 %vm312_vm0, %v282_v9  ;;  %1127 = vmatmul.mubr.msk.f32.gmra.mrb[8].mxu1 %vm312_vm0, %v282_v9 }
  0x65   : > { %431 = vmatprep.mubr.f32.mxu0 %v1556_v0  ;;  %544 = vmatprep.mubr.f32.mxu1 %v1556_v0 }
  0x68   : > { %1120 = vmatmul.mubr.msk.f32.gmra.mrb[10].mxu0 %vm312_vm0, %v283_v10  ;;  %1128 = vmatmul.mubr.msk.f32.gmra.mrb[10].mxu1 %vm312_vm0, %v283_v10 }
  0x69   : > { %437 = vmatprep.mubr.f32.mxu0 %v1556_v0  ;;  %550 = vmatprep.mubr.f32.mxu1 %v1556_v0 }
  0x6c   : > { %1121 = vmatmul.mubr.msk.f32.gmra.mrb[12].mxu0 %vm312_vm0, %v284_v11  ;;  %1129 = vmatmul.mubr.msk.f32.gmra.mrb[12].mxu1 %vm312_vm0, %v284_v11 }
  0x6d   : > { %443 = vmatprep.mubr.f32.mxu0 %v1556_v0  ;;  %556 = vmatprep.mubr.f32.mxu1 %v1556_v0 }
  0x70   : > { %1122 = vmatmul.mubr.msk.f32.gmra.mrb[14].mxu0 %vm312_vm0, %v285_v12  ;;  %1130 = vmatmul.mubr.msk.f32.gmra.mrb[14].mxu1 %vm312_vm0, %v285_v12 }
 0x127   : > { %v403_v24 = vpop.f32.mrb[0].mxu0  ;;  %v516_v25 = vpop.f32.mrb[0].mxu1 }
 0x128   : > { %v404_v26 = vadd.f32 %v403_v24, %v1755_v20  ;;  %v517_v27 = vadd.f32 %v516_v25, %v1757_v21  ;;  %v405_v28 = vpop.f32.mrb[1].mxu0  ;;  %v518_v29 = vpop.f32.mrb[1].mxu1 }
 0x129   : > { %v406_v30 = vadd.f32 %v405_v28, %v1759_v22  ;;  %v519_v31 = vadd.f32 %v518_v29, %v1761_v23 }
 0x12a   : > { %563 = vst [vmem:[#allocation2] sm:$0xff] %v404_v26  ;;  %565 = vst [vmem:[#allocation2 + $0x10] sm:$0xff] %v517_v27 }
 0x12b   : > { %564 = vst [vmem:[#allocation2 + $0x8] sm:$0xff] %v406_v30  ;;  %566 = vst [vmem:[#allocation2 + $0x18] sm:$0xff] %v519_v31  ;;  %v409_v32 = vpop.f32.mrb[2].mxu0  ;;  %v522_v33 = vpop.f32.mrb[2].mxu1 }
 0x12c   : > { %v410_v34 = vadd.f32 %v409_v32, %v1755_v20  ;;  %v523_v35 = vadd.f32 %v522_v33, %v1757_v21  ;;  %v411_v36 = vpop.f32.mrb[3].mxu0  ;;  %v524_v37 = vpop.f32.mrb[3].mxu1 }
 0x12d   : > { %v412_v38 = vadd.f32 %v411_v36, %v1759_v22  ;;  %v525_v39 = vadd.f32 %v524_v37, %v1761_v23 }
 0x12e   : > { %567 = vst [vmem:[#allocation2 + $0x20] sm:$0xff] %v410_v34  ;;  %569 = vst [vmem:[#allocation2 + $0x30] sm:$0xff] %v523_v35 }
 0x12f   : > { %568 = vst [vmem:[#allocation2 + $0x28] sm:$0xff] %v412_v38  ;;  %570 = vst [vmem:[#allocation2 + $0x38] sm:$0xff] %v525_v39  ;;  %v415_v40 = vpop.f32.mrb[4].mxu0  ;;  %v528_v41 = vpop.f32.mrb[4].mxu1 }
 0x130   : > { %v416_v42 = vadd.f32 %v415_v40, %v1755_v20  ;;  %v529_v43 = vadd.f32 %v528_v41, %v1757_v21  ;;  %v417_v44 = vpop.f32.mrb[5].mxu0  ;;  %v530_v45 = vpop.f32.mrb[5].mxu1 }
 0x131   : > { %v418_v46 = vadd.f32 %v417_v44, %v1759_v22  ;;  %v531_v47 = vadd.f32 %v530_v45, %v1761_v23 }
 0x132   : > { %571 = vst [vmem:[#allocation2 + $0x40] sm:$0xff] %v416_v42  ;;  %573 = vst [vmem:[#allocation2 + $0x50] sm:$0xff] %v529_v43 }
 0x133   : > { %572 = vst [vmem:[#allocation2 + $0x48] sm:$0xff] %v418_v46  ;;  %574 = vst [vmem:[#allocation2 + $0x58] sm:$0xff] %v531_v47  ;;  %v421_v48 = vpop.f32.mrb[6].mxu0  ;;  %v534_v49 = vpop.f32.mrb[6].mxu1 }
 0x134   : > { %v422_v50 = vadd.f32 %v421_v48, %v1755_v20  ;;  %v535_v51 = vadd.f32 %v534_v49, %v1757_v21  ;;  %v423_v52 = vpop.f32.mrb[7].mxu0  ;;  %v536_v53 = vpop.f32.mrb[7].mxu1 }
 0x135   : > { %v424_v54 = vadd.f32 %v423_v52, %v1759_v22  ;;  %v537_v55 = vadd.f32 %v536_v53, %v1761_v23 }
 0x136   : > { %575 = vst [vmem:[#allocation2 + $0x60] sm:$0xff] %v422_v50  ;;  %577 = vst [vmem:[#allocation2 + $0x70] sm:$0xff] %v535_v51 }
 0x137   : > { %576 = vst [vmem:[#allocation2 + $0x68] sm:$0xff] %v424_v54  ;;  %578 = vst [vmem:[#allocation2 + $0x78] sm:$0xff] %v537_v55  ;;  %v427_v56 = vpop.f32.mrb[8].mxu0  ;;  %v540_v57 = vpop.f32.mrb[8].mxu1 }
 0x138   : > { %v428_v58 = vadd.f32 %v427_v56, %v1755_v20  ;;  %v541_v59 = vadd.f32 %v540_v57, %v1757_v21  ;;  %v429_v60 = vpop.f32.mrb[9].mxu0  ;;  %v542_v61 = vpop.f32.mrb[9].mxu1 }
 0x139   : > { %v430_v62 = vadd.f32 %v429_v60, %v1759_v22  ;;  %v543_v63 = vadd.f32 %v542_v61, %v1761_v23 }
 0x13a   : > { %579 = vst [vmem:[#allocation2 + $0x80] sm:$0xff] %v428_v58  ;;  %581 = vst [vmem:[#allocation2 + $0x90] sm:$0xff] %v541_v59 }
 0x13b   : > { %580 = vst [vmem:[#allocation2 + $0x88] sm:$0xff] %v430_v62  ;;  %582 = vst [vmem:[#allocation2 + $0x98] sm:$0xff] %v543_v63  ;;  %v433_v0 = vpop.f32.mrb[10].mxu0  ;;  %v546_v1 = vpop.f32.mrb[10].mxu1 }
 0x13c   : > { %v434_v2 = vadd.f32 %v433_v0, %v1755_v20  ;;  %v547_v3 = vadd.f32 %v546_v1, %v1757_v21  ;;  %v435_v4 = vpop.f32.mrb[11].mxu0  ;;  %v548_v5 = vpop.f32.mrb[11].mxu1 }
 0x13d   : > { %v436_v6 = vadd.f32 %v435_v4, %v1759_v22  ;;  %v549_v7 = vadd.f32 %v548_v5, %v1761_v23 }
 0x13e   : > { %583 = vst [vmem:[#allocation2 + $0xa0] sm:$0xff] %v434_v2  ;;  %585 = vst [vmem:[#allocation2 + $0xb0] sm:$0xff] %v547_v3 }
 0x13f   : > { %584 = vst [vmem:[#allocation2 + $0xa8] sm:$0xff] %v436_v6  ;;  %586 = vst [vmem:[#allocation2 + $0xb8] sm:$0xff] %v549_v7  ;;  %v439_v8 = vpop.f32.mrb[12].mxu0  ;;  %v552_v9 = vpop.f32.mrb[12].mxu1 }
 0x140   : > { %v440_v10 = vadd.f32 %v439_v8, %v1755_v20  ;;  %v553_v11 = vadd.f32 %v552_v9, %v1757_v21  ;;  %v441_v12 = vpop.f32.mrb[13].mxu0  ;;  %v554_v13 = vpop.f32.mrb[13].mxu1 }
 0x141   : > { %v442_v14 = vadd.f32 %v441_v12, %v1759_v22  ;;  %v555_v15 = vadd.f32 %v554_v13, %v1761_v23 }
 0x142   : > { %587 = vst [vmem:[#allocation2 + $0xc0] sm:$0xff] %v440_v10  ;;  %589 = vst [vmem:[#allocation2 + $0xd0] sm:$0xff] %v553_v11 }
 0x143   : > { %588 = vst [vmem:[#allocation2 + $0xc8] sm:$0xff] %v442_v14  ;;  %590 = vst [vmem:[#allocation2 + $0xd8] sm:$0xff] %v555_v15  ;;  %v445_v16 = vpop.f32.mrb[14].mxu0  ;;  %v558_v17 = vpop.f32.mrb[14].mxu1 }
 0x144   : > { %v446_v18 = vadd.f32 %v445_v16, %v1755_v20  ;;  %v559_v19 = vadd.f32 %v558_v17, %v1757_v21  ;;  %v447_v24 = vpop.f32.mrb[15].mxu0  ;;  %v560_v25 = vpop.f32.mrb[15].mxu1 }
 0x145   : > { %v448_v26 = vadd.f32 %v447_v24, %v1759_v22  ;;  %v561_v27 = vadd.f32 %v560_v25, %v1761_v23 }
 0x146   : > { %591 = vst [vmem:[#allocation2 + $0xe0] sm:$0xff] %v446_v18  ;;  %593 = vst [vmem:[#allocation2 + $0xf0] sm:$0xff] %v559_v19 }
 0x147   : > { %592 = vst [vmem:[#allocation2 + $0xe8] sm:$0xff] %v448_v26  ;;  %594 = vst [vmem:[#allocation2 + $0xf8] sm:$0xff] %v561_v27 }
 0x148 LB: >> { %v616_v20 = vld [vmem:[#allocation9 + $0x8] sm:$0xff]  ;;  %v615_v28 = vld [vmem:[#allocation9] sm:$0xff]  ;;  %v1557_v31 = vmov 0.0   ;;  %v618_v43 = vld [vmem:[#allocation9 + $0x18] sm:$0xff]  ;;  %s1131_s26 = sshll.u32 %s1550_s11, 3  ;;  %s602_s11 = sadd.s32 1, %s1550_s11   ;;  %s1550_s11 = sphi %s1798_s11, %s602_s11  }
 0x149   : >> { %v620_v21 = vld [vmem:[#allocation9 + $0x28] sm:$0xff]  ;;  %v619_v22 = vld [vmem:[#allocation9 + $0x20] sm:$0xff]  ;;  %743 = vmatprep.mubr.f32.mxu0 %v1557_v31  ;;  %814 = vmatprep.mubr.f32.mxu1 %v1557_v31  ;;  %v622_v44 = vld [vmem:[#allocation9 + $0x38] sm:$0xff]  ;;  %s604_s28 = sshra.s32 %s1131_s26, 3  ;;  %s851_s9 = scalar_lea.vmem [#allocation3], %s1131_s26 }
 0x14a   : >> { %v1214_v29 = vpack.c.bf16 %v620_v21, %v616_v20  ;;  %v624_v30 = vld [vmem:[#allocation9 + $0x48] sm:$0xff]  ;;  %v1216_v32 = vpack.c.bf16 %v619_v22, %v615_v28  ;;  %v623_v34 = vld [vmem:[#allocation9 + $0x40] sm:$0xff]  ;;  %v1246_v46 = vpack.c.bf16 %v622_v44, %v618_v43  ;;  %v617_v47 = vld [vmem:[#allocation9 + $0x10] sm:$0xff]  ;;  %s1144_s29 = sshll.u32 %s604_s28, 5  ;;  %p599_p10 = scmp.ge.s32.totalorder %s602_s11, 8  }
 0x14b   : >> { %v628_v23 = vld [vmem:[#allocation9 + $0x68] sm:$0xff]  ;;  %v627_v35 = vld [vmem:[#allocation9 + $0x60] sm:$0xff]  ;;  %v621_v48 = vld [vmem:[#allocation9 + $0x30] sm:$0xff]  ;;  %s608_s10 = scalar_lea.vmem [#allocation2], %s1144_s29  ;;  %s1145_s11 = sshll.u32 (%p599_p10), %s1617_s25, 10 }
 0x14c   : >> { %v1218_v33 = vpack.c.bf16 %v628_v23, %v624_v30  ;;  %v632_v36 = vld [vmem:[#allocation9 + $0x88] sm:$0xff]  ;;  %1215 = vmatprep.subr.bf16.mxu0 %v1214_v29  ;;  %v1220_v38 = vpack.c.bf16 %v627_v35, %v623_v34  ;;  %v631_v39 = vld [vmem:[#allocation9 + $0x80] sm:$0xff]  ;;  %v1248_v49 = vpack.c.bf16 %v621_v48, %v617_v47  ;;  %1247 = vmatprep.subr.bf16.mxu1 %v1246_v46  ;;  %v626_v51 = vld [vmem:[#allocation9 + $0x58] sm:$0xff]  ;;  %s1011_s28 = sshll.u32 (%p599_p10), %s1796_s20, 4  ;;  %s1871_s25 = scalar_lea.hbm (%p599_p10), %s1928_s6, %s1145_s11  ;;  %s1873_s28 = int_to_ptr.vmem [resolvable:$true] %s1011_s28 }
 0x14d   : >> { %v636_v37 = vld [vmem:[#allocation9 + $0xa8] sm:$0xff]  ;;  %1217 = vmatpush1.bf16.msra.mxu0 %v1216_v32  ;;  %v635_v40 = vld [vmem:[#allocation9 + $0xa0] sm:$0xff]  ;;  %v630_v52 = vld [vmem:[#allocation9 + $0x78] sm:$0xff]  ;;  %s1472_s14 = scalar_lea.vmem (%p599_p10), %s1873_s28, 1024  ;;  %p1941_p2 = scmp.ne.s32.totalorder (%p599_p10), %s1932_s7, 0 }
 0x14e   : >> { %1219 = vmatprep.subr.bf16.mxu0 %v1218_v33  ;;  %v1222_v41 = vpack.c.bf16 %v636_v37, %v632_v36  ;;  %v640_v42 = vld [vmem:[#allocation9 + $0xc8] sm:$0xff]  ;;  %v1224_v50 = vpack.c.bf16 %v635_v40, %v631_v39  ;;  %v625_v53 = vld [vmem:[#allocation9 + $0x50] sm:$0xff]  ;;  %v639_v55 = vld [vmem:[#allocation9 + $0xc0] sm:$0xff]  ;;  %1249 = vmatpush1.bf16.msra.mxu1 %v1248_v49  ;;  %v1250_v57 = vpack.c.bf16 %v630_v52, %v626_v51  ;;  %p1473_p1 = scmp.ne.s32.totalorder (%p599_p10), %s1873_s28, %s1472_s14  ;;  %s1558_s12 = smov (%p599_p10), [#allocation11]  }
 0x14f   : >> { %v644_v45 = vld [vmem:[#allocation9 + $0xe8] sm:$0xff]  ;;  %v643_v56 = vld [vmem:[#allocation9 + $0xe0] sm:$0xff]  ;;  %v629_v58 = vld [vmem:[#allocation9 + $0x70] sm:$0xff]  ;;  %s1476_s15 = sshll.u32 (%p599_p10), %s1558_s12, 4  ;;  %s1477_s15 = int_to_ptr.vmem [resolvable:$false] %s1476_s15 }
 0x150   : >> { %v1226_v54 = vpack.c.bf16 %v644_v45, %v640_v42  ;;  %v648_v59 = vld [vmem:[#allocation9 + $0x108] sm:$0xff]  ;;  %v1252_v61 = vpack.c.bf16 %v629_v58, %v625_v53  ;;  %v634_v62 = vld [vmem:[#allocation9 + $0x98] sm:$0xff]  ;;  %1251 = vmatprep.subr.bf16.mxu1 %v1250_v57  ;;  %v633_v0 = vld [vmem:[#allocation9 + $0x90] sm:$0xff]  ;;  %v1228_v2 = vpack.c.bf16 %v643_v56, %v639_v55  ;;  %p1474_p3 = pnand (%p599_p10), %p1473_p1, %p1941_p2  ;;  %s1478_s16 = scalar_lea.vmem (%p599_p10), %s1477_s15, 2048 }
 0x151   : >> { %1221 = vmatpush1.bf16.msra.mxu0 %v1220_v38  ;;  %v652_v60 = vld [vmem:[#allocation9 + $0x128] sm:$0xff]  ;;  %v638_v63 = vld [vmem:[#allocation9 + $0xb8] sm:$0xff]  ;;  %v637_v1 = vld [vmem:[#allocation9 + $0xb0] sm:$0xff]  ;;  %p1479_p7 = scmp.lt.s32.totalorder (%p599_p10), %s1873_s28, %s1477_s15  ;;  %p1480_p8 = scmp.lt.s32.totalorder (%p599_p10), %s1478_s16, %s1472_s14 }
 0x152   : >> { %1223 = vmatprep.subr.bf16.mxu0 %v1222_v41  ;;  %v647_v3 = vld [vmem:[#allocation9 + $0x100] sm:$0xff]  ;;  %v1254_v5 = vpack.c.bf16 %v638_v63, %v634_v62  ;;  %v1230_v6 = vpack.c.bf16 %v652_v60, %v648_v59  ;;  %1253 = vmatpush1.bf16.msra.mxu1 %v1252_v61  ;;  %v656_v7 = vld [vmem:[#allocation9 + $0x148] sm:$0xff]  ;;  %v1256_v8 = vpack.c.bf16 %v637_v1, %v633_v0  ;;  %v642_v9 = vld [vmem:[#allocation9 + $0xd8] sm:$0xff]  ;;  %p1475_p4 = pneg (%p599_p10), %p1474_p3 }
 0x153   : >> { %v651_v4 = vld [vmem:[#allocation9 + $0x120] sm:$0xff]  ;;  %v646_v10 = vld [vmem:[#allocation9 + $0xf8] sm:$0xff]  ;;  %v660_v11 = vld [vmem:[#allocation9 + $0x168] sm:$0xff]  ;;  %p1481_p11 = por (%p599_p10), %p1480_p8, %p1479_p7 }
 0x154   : >> { %1255 = vmatprep.subr.bf16.mxu1 %v1254_v5  ;;  %v1258_v12 = vpack.c.bf16 %v646_v10, %v642_v9  ;;  %v641_v13 = vld [vmem:[#allocation9 + $0xd0] sm:$0xff]  ;;  %v1232_v15 = vpack.c.bf16 %v651_v4, %v647_v3  ;;  %v650_v16 = vld [vmem:[#allocation9 + $0x118] sm:$0xff]  ;;  %v1234_v18 = vpack.c.bf16 %v660_v11, %v656_v7  ;;  %v655_v19 = vld [vmem:[#allocation9 + $0x140] sm:$0xff] }
 0x155   : >> { %1225 = vmatpush1.bf16.msra.mxu0 %v1224_v50  ;;  %v645_v14 = vld [vmem:[#allocation9 + $0xf0] sm:$0xff]  ;;  %v654_v17 = vld [vmem:[#allocation9 + $0x138] sm:$0xff]  ;;  %v659_v24 = vld [vmem:[#allocation9 + $0x160] sm:$0xff]  ;;  %p1482_p13 = pnand (%p599_p10), %p1481_p11, %p1475_p4 }
 0x156   : >> { %1227 = vmatprep.subr.bf16.mxu0 %v1226_v54  ;;  %1257 = vmatpush1.bf16.msra.mxu1 %v1256_v8  ;;  %v664_v25 = vld [vmem:[#allocation9 + $0x188] sm:$0xff]  ;;  %v1260_v26 = vpack.c.bf16 %v645_v14, %v641_v13  ;;  %v1262_v20 = vpack.c.bf16 %v654_v17, %v650_v16  ;;  %v649_v21 = vld [vmem:[#allocation9 + $0x110] sm:$0xff]  ;;  %v658_v29 = vld [vmem:[#allocation9 + $0x158] sm:$0xff]  ;;  %v1236_v30 = vpack.c.bf16 %v659_v24, %v655_v19 }
 0x157   : >> { %v668_v27 = vld [vmem:[#allocation9 + $0x1a8] sm:$0xff]  ;;  %1259 = vmatprep.subr.bf16.mxu1 %v1258_v12  ;;  %v653_v28 = vld [vmem:[#allocation9 + $0x130] sm:$0xff]  ;;  %v662_v22 = vld [vmem:[#allocation9 + $0x178] sm:$0xff] }
 0x158   : >> { %v1238_v23 = vpack.c.bf16 %v668_v27, %v664_v25  ;;  %v663_v31 = vld [vmem:[#allocation9 + $0x180] sm:$0xff]  ;;  %v672_v33 = vld [vmem:[#allocation9 + $0x1c8] sm:$0xff]  ;;  %v1264_v34 = vpack.c.bf16 %v653_v28, %v649_v21  ;;  %v1266_v36 = vpack.c.bf16 %v662_v22, %v658_v29  ;;  %v657_v37 = vld [vmem:[#allocation9 + $0x150] sm:$0xff] }
 0x159   : >> { %1229 = vmatpush1.bf16.msra.mxu0 %v1228_v2  ;;  %v667_v32 = vld [vmem:[#allocation9 + $0x1a0] sm:$0xff]  ;;  %v676_v35 = vld [vmem:[#allocation9 + $0x1e8] sm:$0xff]  ;;  %v661_v38 = vld [vmem:[#allocation9 + $0x170] sm:$0xff] }
 0x15a   : >> { %1231 = vmatprep.subr.bf16.mxu0 %v1230_v6  ;;  %1261 = vmatpush1.bf16.msra.mxu1 %v1260_v26  ;;  %v666_v39 = vld [vmem:[#allocation9 + $0x198] sm:$0xff]  ;;  %v1240_v41 = vpack.c.bf16 %v667_v32, %v663_v31  ;;  %v1242_v42 = vpack.c.bf16 %v676_v35, %v672_v33  ;;  %v671_v43 = vld [vmem:[#allocation9 + $0x1c0] sm:$0xff]  ;;  %v1268_v45 = vpack.c.bf16 %v661_v38, %v657_v37  ;;  %v665_v47 = vld [vmem:[#allocation9 + $0x190] sm:$0xff] }
 0x15b   : >> { %1263 = vmatprep.subr.bf16.mxu1 %v1262_v20  ;;  %v670_v40 = vld [vmem:[#allocation9 + $0x1b8] sm:$0xff]  ;;  %v675_v44 = vld [vmem:[#allocation9 + $0x1e0] sm:$0xff]  ;;  %v669_v48 = vld [vmem:[#allocation9 + $0x1b0] sm:$0xff] }
 0x15c   : >> { %v1270_v46 = vpack.c.bf16 %v670_v40, %v666_v39  ;;  %v674_v49 = vld [vmem:[#allocation9 + $0x1d8] sm:$0xff]  ;;  %v1244_v51 = vpack.c.bf16 %v675_v44, %v671_v43  ;;  %v1272_v52 = vpack.c.bf16 %v669_v48, %v665_v47  ;;  %v673_v54 = vld [vmem:[#allocation9 + $0x1d0] sm:$0xff]  ;;  %v612_v2 = vld [vmem:[%s608_s10 + $0x18] sm:$0xff] }
 0x15d   : >> { %1233 = vmatpush1.bf16.msra.mxu0 %v1232_v15  ;;  %v678_v50 = vld [vmem:[#allocation9 + $0x1f8] sm:$0xff]  ;;  %v677_v55 = vld [vmem:[#allocation9 + $0x1f0] sm:$0xff]  ;;  %v611_v6 = vld [vmem:[%s608_s10 + $0x10] sm:$0xff] }
 0x15e   : >> { %1235 = vmatprep.subr.bf16.mxu0 %v1234_v18  ;;  %1265 = vmatpush1.bf16.msra.mxu1 %v1264_v34  ;;  %v1274_v53 = vpack.c.bf16 %v678_v50, %v674_v49  ;;  %v613_v56 = vld [vmem:[#allocation4] sm:$0xff]  ;;  %v1276_v57 = vpack.c.bf16 %v677_v55, %v673_v54  ;;  %v610_v59 = vld [vmem:[%s608_s10 + $0x8] sm:$0xff]  ;;  %v863_v29 = vld [vmem:[%s1926_s4 + $0x10] sm:$0xff] (%p599_p10) }
 0x15f   : >> { %1267 = vmatprep.subr.bf16.mxu1 %v1266_v36  ;;  %v609_v58 = vld [vmem:[%s608_s10] sm:$0xff]  ;;  %v614_v15 = vld [vmem:[#allocation5] sm:$0xff]  ;;  %v867_v36 = vld [vmem:[%s1926_s4 + $0x30] sm:$0xff] (%p599_p10) }
 0x160   : > { %v861_v21 = vld [vmem:[%s1926_s4] sm:$0xff] (%p599_p10)  ;;  %v862_v28 = vld [vmem:[%s1926_s4 + $0x8] sm:$0xff] (%p599_p10)  ;;  %v868_v37 = vld [vmem:[%s1926_s4 + $0x38] sm:$0xff] (%p599_p10) }
 0x161   : >> { %1237 = vmatpush1.bf16.msra.mxu0 %v1236_v30  ;;  %v1278_v22 = vpack.c.bf16 (%p599_p10), %v862_v28, %v861_v21  ;;  %v864_v30 = vld [vmem:[%s1926_s4 + $0x18] sm:$0xff] (%p599_p10)  ;;  %v865_v31 = vld [vmem:[%s1926_s4 + $0x20] sm:$0xff] (%p599_p10)  ;;  %v866_v32 = vld [vmem:[%s1926_s4 + $0x28] sm:$0xff] (%p599_p10)  ;;  %v1290_v38 = vpack.c.bf16 (%p599_p10), %v868_v37, %v867_v36 }
 0x162   : >> { %1239 = vmatprep.subr.bf16.mxu0 %v1238_v23  ;;  %1269 = vmatpush1.bf16.msra.mxu1 %v1268_v45  ;;  %v1282_v23 = vpack.c.bf16 (%p599_p10), %v864_v30, %v863_v29  ;;  %v1286_v33 = vpack.c.bf16 (%p599_p10), %v866_v32, %v865_v31  ;;  %v869_v39 = vld [vmem:[%s1926_s4 + $0x40] sm:$0xff] (%p599_p10)  ;;  %v870_v40 = vld [vmem:[%s1926_s4 + $0x48] sm:$0xff] (%p599_p10)  ;;  %v872_v43 = vld [vmem:[%s1926_s4 + $0x58] sm:$0xff] (%p599_p10) }
 0x163   : >> { %1271 = vmatprep.subr.bf16.mxu1 %v1270_v46  ;;  %v873_v45 = vld [vmem:[%s1926_s4 + $0x60] sm:$0xff] (%p599_p10)  ;;  %v874_v46 = vld [vmem:[%s1926_s4 + $0x68] sm:$0xff] (%p599_p10)  ;;  %v875_v48 = vld [vmem:[%s1926_s4 + $0x70] sm:$0xff] (%p599_p10) }
 0x164   : > { %v1302_v47 = vpack.c.bf16 (%p599_p10), %v874_v46, %v873_v45  ;;  %v876_v49 = vld [vmem:[%s1926_s4 + $0x78] sm:$0xff] (%p599_p10) }
 0x165   : >> { %1241 = vmatpush1.bf16.msra.mxu0 %v1240_v41  ;;  %v1294_v41 = vpack.c.bf16 (%p599_p10), %v870_v40, %v869_v39  ;;  %v1306_v50 = vpack.c.bf16 (%p599_p10), %v876_v49, %v875_v48 }
 0x166   : >> { %1243 = vmatprep.subr.bf16.mxu0 %v1242_v42  ;;  %1273 = vmatpush1.bf16.msra.mxu1 %v1272_v52  ;;  %v871_v42 = vld [vmem:[%s1926_s4 + $0x50] sm:$0xff] (%p599_p10) }
 0x167   : >> { %1275 = vmatprep.subr.bf16.mxu1 %v1274_v53  ;;  %v1298_v44 = vpack.c.bf16 (%p599_p10), %v872_v43, %v871_v42 }
 0x169   : >> { %1245 = vmatpush1.bf16.msra.mxu0 %v1244_v51 }
 0x16a   : >> { %1277 = vmatpush1.bf16.msra.mxu1 %v1276_v57  ;;  %1279 = vmatprep.subr.bf16.mxu0 (%p599_p10), %v1278_v22  ;;  %v1137_v57 = vld [vmem:[%s1927_s5] ss:$0 sm:$0xff] (%p599_p10) }
 0x16b   : > { %1310 = vmatprep.subr.bf16.mxu1 (%p599_p10), %v1278_v22 }
 0x16c   : >> { %744 = vmatmul.mubr.f32.vlgmr.msra.gmra.mrb[0].mxu0 %v613_v56 }
 0x16d   : >> { %815 = vmatmul.mubr.f32.vlgmr.msra.gmra.mrb[0].mxu1 %v613_v56  ;;  %1281 = vmatpush3.bf16.msra.mxu0 (%p599_p10), %v1278_v22 }
 0x16e   : > { %1318 = vmatpush3.bf16.msra.mxu1 (%p599_p10), %v1278_v22  ;;  %1283 = vmatprep.subr.bf16.mxu0 (%p599_p10), %v1282_v23 }
 0x16f   : > { %1311 = vmatprep.subr.bf16.mxu1 (%p599_p10), %v1282_v23 }
 0x171   : > { %1285 = vmatpush3.bf16.msra.mxu0 (%p599_p10), %v1282_v23 }
 0x172   : > { %1319 = vmatpush3.bf16.msra.mxu1 (%p599_p10), %v1282_v23  ;;  %1287 = vmatprep.subr.bf16.mxu0 (%p599_p10), %v1286_v33 }
 0x173   : > { %1312 = vmatprep.subr.bf16.mxu1 (%p599_p10), %v1286_v33 }
 0x175   : > { %1289 = vmatpush3.bf16.msra.mxu0 (%p599_p10), %v1286_v33 }
 0x176   : > { %1320 = vmatpush3.bf16.msra.mxu1 (%p599_p10), %v1286_v33  ;;  %1291 = vmatprep.subr.bf16.mxu0 (%p599_p10), %v1290_v38 }
 0x177   : > { %1313 = vmatprep.subr.bf16.mxu1 (%p599_p10), %v1290_v38 }
 0x179   : > { %1293 = vmatpush3.bf16.msra.mxu0 (%p599_p10), %v1290_v38 }
 0x17a   : > { %1321 = vmatpush3.bf16.msra.mxu1 (%p599_p10), %v1290_v38  ;;  %1295 = vmatprep.subr.bf16.mxu0 (%p599_p10), %v1294_v41 }
 0x17b   : > { %1314 = vmatprep.subr.bf16.mxu1 (%p599_p10), %v1294_v41 }
 0x17d   : > { %1297 = vmatpush3.bf16.msra.mxu0 (%p599_p10), %v1294_v41 }
 0x17e   : > { %1322 = vmatpush3.bf16.msra.mxu1 (%p599_p10), %v1294_v41  ;;  %1299 = vmatprep.subr.bf16.mxu0 (%p599_p10), %v1298_v44 }
 0x17f   : > { %1315 = vmatprep.subr.bf16.mxu1 (%p599_p10), %v1298_v44 }
 0x181   : > { %1301 = vmatpush3.bf16.msra.mxu0 (%p599_p10), %v1298_v44 }
 0x182   : > { %1323 = vmatpush3.bf16.msra.mxu1 (%p599_p10), %v1298_v44  ;;  %1303 = vmatprep.subr.bf16.mxu0 (%p599_p10), %v1302_v47 }
 0x183   : > { %1316 = vmatprep.subr.bf16.mxu1 (%p599_p10), %v1302_v47 }
 0x185   : > { %1305 = vmatpush3.bf16.msra.mxu0 (%p599_p10), %v1302_v47 }
 0x186   : > { %1324 = vmatpush3.bf16.msra.mxu1 (%p599_p10), %v1302_v47  ;;  %1307 = vmatprep.subr.bf16.mxu0 (%p599_p10), %v1306_v50 }
 0x187   : > { %1317 = vmatprep.subr.bf16.mxu1 (%p599_p10), %v1306_v50 }
 0x189   : > { %1309 = vmatpush3.bf16.msra.mxu0 (%p599_p10), %v1306_v50 }
 0x18a   : > { %1325 = vmatpush3.bf16.msra.mxu1 (%p599_p10), %v1306_v50 }
 0x23f   : >> { %v745_v60 = vpop.f32.mrb[0].mxu0 }
 0x240   : >> { %v821_v61 = vadd.f32 %v745_v60, %v609_v58  ;;  %v747_v62 = vpop.f32.mrb[1].mxu0  ;;  %v816_v3 = vpop.f32.mrb[0].mxu1 }
 0x241   : >> { %v822_v63 = vadd.f32 %v747_v62, %v610_v59  ;;  %v818_v4 = vpop.f32.mrb[1].mxu1  ;;  %v823_v8 = vadd.f32 %v816_v3, %v611_v6 }
 0x242   : >> { %v1134_v0 = vmul.f32 -1.442695, %v821_v61  ;;  %v824_v5 = vadd.f32 %v818_v4, %v612_v2 }
 0x243   : >> { %v1135_v1 = vmul.f32 -1.442695, %v822_v63 }
 0x244   : >> { %1400 = vpow2.f32 %v1134_v0  ;;  %v1136_v7 = vmul.f32 -1.442695, %v824_v5 }
 0x245   : >> { %1402 = vpow2.f32 %v1135_v1 }
 0x246   : >> { %1404 = vpow2.f32 %v1136_v7 }
 0x247   : >> { %1406 = vtanh.f32 %v823_v8 }
 0x24e   : >> { %v1401_v9 = vpop.eup %1400 }
 0x24f   : >> { %v1403_v10 = vpop.eup %1402  ;;  %v828_v11 = vadd.f32 1.0, %v1401_v9 }
 0x250   : >> { %v834_v12 = vadd.f32 1.0, %v1403_v10  ;;  %v1405_v13 = vpop.eup %1404 }
 0x251   : >> { %1408 = vrcp.f32 %v828_v11  ;;  %v1407_v14 = vpop.eup %1406  ;;  %v841_v17 = vadd.f32 1.0, %v1405_v13 }
 0x252   : >> { %1410 = vrcp.f32 %v834_v12 }
 0x253   : >> { %1412 = vrcp.f32 %v841_v17 }
 0x25b   : >> { %v1409_v16 = vpop.eup %1408 }
 0x25c   : >> { %v1411_v18 = vpop.eup %1410  ;;  %v845_v19 = vmul.f32 %v1409_v16, %v1407_v14 }
 0x25d   : >> { %v844_v24 = vmul.f32 %v1411_v18, %v614_v15  ;;  %v1413_v26 = vpop.eup %1412 }
 0x25f   : >> { %v846_v25 = vadd.f32 %v845_v19, %v844_v24 }
 0x261   : >> { %1414 = vtanh.f32 %v846_v25  ;;  %849 = vst [vmem:[#allocation5] sm:$0xff] %v846_v25 }
 0x268   : > { %601 = sbr.rel (!%p599_p10) target bundleno = 328 (0x148), region = 97 }
 0x26b   : >> { %v1415_v27 = vpop.eup %1414 }
 0x26c   : >> { %v848_v20 = vmul.f32 %v1415_v27, %v1413_v26 }
 0x26e   : >> { %850 = vst [vmem:[#allocation4] sm:$0xff] %v848_v20  ;;  %852 = vst [vmem:[%s851_s9] sm:$0xff] %v848_v20  ;;  %s1881_s9 = scalar_lea.sflag (%p599_p10), [#allocation8], %s270_s13 }
 0x275   : > { %v853_v34 = vld [vmem:[#allocation3] sm:$0xff]  ;;  %v854_v51 = vld [vmem:[#allocation3 + $0x8] sm:$0xff]  ;;  %v855_v53 = vld [vmem:[#allocation3 + $0x10] sm:$0xff] }
 0x276   : > { %v857_v35 = vld [vmem:[#allocation3 + $0x20] sm:$0xff]  ;;  %1202 = vmatprep.mubr.f32.mxu0 %v853_v34  ;;  %v858_v52 = vld [vmem:[#allocation3 + $0x28] sm:$0xff]  ;;  %v859_v54 = vld [vmem:[#allocation3 + $0x30] sm:$0xff] }
 0x277   : > { %1208 = vmatprep.mubr.f32.mxu1 %v857_v35  ;;  %1203 = vmatmul.mubr.f32.vlgmr.msra.gmra.mrb[0].mxu0 %v854_v51  ;;  %v856_v55 = vld [vmem:[#allocation3 + $0x18] sm:$0xff] }
 0x278   : > { %1209 = vmatmul.mubr.f32.vlgmr.msra.gmra.mrb[0].mxu1 %v858_v52  ;;  %1205 = vmatprep.mubr.f32.mxu0 %v855_v53  ;;  %v860_v56 = vld [vmem:[#allocation3 + $0x38] sm:$0xff] }
 0x279   : > { %1211 = vmatprep.mubr.f32.mxu1 %v859_v54 }
 0x27b   : > { %1206 = vmatmul.mubr.f32.gmra.mrb[2].mxu0 %v856_v55 }
 0x27c   : > { %1212 = vmatmul.mubr.f32.gmra.mrb[2].mxu1 %v860_v56 }
 0x34a   : > { %v1204_v58 = vpop.f32.mrb[0].mxu0 }
 0x34b   : > { %v1210_v59 = vpop.f32.mrb[0].mxu1  ;;  %v956_v60 = vadd.f32 %v1204_v58, %v1137_v57  ;;  %v950_v62 = vpop.f32.mrb[1].mxu0 }
 0x34c   : > { %v976_v61 = vadd.f32 %v1210_v59, %v1137_v57  ;;  %v970_v63 = vpop.f32.mrb[1].mxu1  ;;  %v951_v0 = vadd.f32 %v1137_v57, %v950_v62 }
 0x34d   : > { %v971_v1 = vadd.f32 %v1137_v57, %v970_v63  ;;  %990 = vst [vmem:[%s1796_s20 + $0x8] sm:$0xff] %v956_v60 }
 0x34e   : > { %994 = vst [vmem:[%s1796_s20 + $0x28] sm:$0xff] %v976_v61  ;;  %989 = vst [vmem:[%s1796_s20] sm:$0xff] %v951_v0  ;;  %v1207_v2 = vpop.f32.mrb[2].mxu0 }
 0x34f   : > { %993 = vst [vmem:[%s1796_s20 + $0x20] sm:$0xff] %v971_v1  ;;  %v1213_v3 = vpop.f32.mrb[2].mxu1  ;;  %v966_v4 = vadd.f32 %v1207_v2, %v1137_v57  ;;  %v960_v6 = vpop.f32.mrb[3].mxu0 }
 0x350   : > { %v986_v5 = vadd.f32 %v1213_v3, %v1137_v57  ;;  %v980_v7 = vpop.f32.mrb[3].mxu1  ;;  %v961_v8 = vadd.f32 %v1137_v57, %v960_v6 }
 0x351   : > { %v981_v9 = vadd.f32 %v1137_v57, %v980_v7  ;;  %992 = vst [vmem:[%s1796_s20 + $0x18] sm:$0xff] %v966_v4 }
 0x352   : > { %996 = vst [vmem:[%s1796_s20 + $0x38] sm:$0xff] %v986_v5  ;;  %991 = vst [vmem:[%s1796_s20 + $0x10] sm:$0xff] %v961_v8 }
 0x353   : > { %995 = vst [vmem:[%s1796_s20 + $0x30] sm:$0xff] %v981_v9 }
 0x354   : > { %1485 = shalt.err (!%p1482_p13)
}
 0x355   : > { %s1486_s13 = scalar_lea.hbm %s1871_s25, 1024  ;;  %s1490_s18 = scalar_lea.hbm %s1928_s6, 2048 }
 0x356   : > { %p1487_p0 = scmp.ne.s32.totalorder %s1871_s25, %s1486_s13  ;;  %p1491_p9 = scmp.lt.u32.totalorder %s1871_s25, %s1928_s6 }
 0x357   : > { %p1492_p12 = scmp.lt.u32.totalorder %s1490_s18, %s1486_s13  ;;  %p1494_p1 = scmp.lt.u32.totalorder %s1486_s13, %s1871_s25 }
 0x358   : > { %p1488_p6 = pnand %p1487_p0, %p1941_p2 }
 0x359   : > { %p1493_p10 = por %p1492_p12, %p1491_p9 }
 0x35a   : > { %p1489_p5 = pneg %p1488_p6 }
 0x35b   : > { %p1495_p3 = por %p1494_p1, %p1493_p10 }
 0x35d   : > { %p1496_p4 = pnand %p1495_p3, %p1489_p5 }
 0x35f   : > { %1499 = shalt.err (!%p1496_p4)
}
 0x360   : > { %s1559_s11 = smov 128   ;;  %s1560_s29 = smov 8  }
 0x361   : > { %1334 = dma.vmem_to_hbm [thread:$0]  (%p1941_p2), %s1873_s28, 1024, %s1871_s25, %s1881_s9, %s1559_s11, %s1559_s11, %s1560_s29  }
 0x362 PF: > { %p1351_p7 = scmp.ge.s32.totalorder %s1546_s24, 2  ;;  %s1026_s10 = sand.u32 1, %s1534_s21  }
 0x363   : > { %p1942_p8 = scmp.ne.s32.totalorder %s1933_s8, 0  ;;  %s1027_s14 = scalar_lea.sflag [#allocation8], %s1026_s10 }
 0x365   : > { %p1344_p11 = pnand %p1351_p7, %p1942_p8 }
 0x367   : > { %1529 = dma.done.wait (!%p1344_p11), %s1027_s14, 1024  }
 0x368   : > { %1531 = vsyncadd (!%p1344_p11), %s1027_s14, 4294966272  ;;  %p18_p13 = scmp.ge.s32.totalorder %s1621_s27, 4   ;;  %s1943_s21 = smov %s1538_s22 }
 0x369   : > { %s1944_s22 = smov %s1542_s23  ;;  %s1945_s23 = smov %s1632_s30 }
 0x36a   : > { %s1946_s24 = smov %s1621_s27  ;;  %20 = sbr.rel (!%p18_p13) target bundleno = 5 (0x5), region = 108 }
 0x371   :  { %1032 = vsyncpa [#allocation7], 1 }
 0x372   :  { %1034 = vsyncpa [#allocation7 + $0x1], 1 }
 0x373   :  { %1035 = vsyncpa [#allocation10], 1 }
 0x374   :  { %1036 = vsyncpa [#allocation8], 1 }
 0x375   :  { %1038 = vsyncpa [#allocation8 + $0x1], 1 }

</bundles_post_ra>
